<compile_context>
chip_gen: v6e
topology: v6e:2x2x1
jax: 0.10.0
libtpu: 0.0.40
codegen_flags: <defaults>
</compile_context>

<pallas_src>
import functools

import jax
import jax.numpy as jnp
from jax.experimental import pallas as pl
from jax.experimental.pallas import tpu as pltpu

_INV_SQRT2 = 0.7071067811865476
_SQRT_2_OVER_PI = 0.7978845608028654


def _round_up(a, b):
    return (a + b - 1) // b * b


def _gelu_f32(h, approximate):
    if approximate:
        # tanh-approx GELU (EUP slot on v6e/v7x); opt-in, deviates from torch default.
        return 0.5 * h * (1.0 + jnp.tanh(_SQRT_2_OVER_PI * (h + 0.044715 * h * h * h)))
    # exact erf-based GELU, matches torch.nn.GELU(approximate='none')
    return 0.5 * h * (1.0 + jax.lax.erf(h * _INV_SQRT2))


# ---------------------------------------------------------------------------
# Kernels
# ---------------------------------------------------------------------------
def _mlp_kernel_resident(x_ref, w1_ref, b1_ref, w2_ref, b2_ref, o_ref, *, approximate):
    """Single-k path: W1/W2 stay resident in VMEM across all row tiles."""
    h = jnp.dot(x_ref[...], w1_ref[...], preferred_element_type=jnp.float32)
    h = _gelu_f32(h + b1_ref[...].astype(jnp.float32), approximate)
    o = jnp.dot(h.astype(w2_ref.dtype), w2_ref[...], preferred_element_type=jnp.float32)
    o_ref[...] = (o + b2_ref[...].astype(jnp.float32)).astype(o_ref.dtype)
    # Dropout(p=0.0) is the identity -> nothing to do.


def _mlp_kernel_ktiled(x_ref, w1_ref, b1_ref, w2_ref, b2_ref, o_ref, acc_ref, *,
                       approximate):
    """Hidden-dim-tiled fallback (weights too large for VMEM residency)."""
    k = pl.program_id(1)

    @pl.when(k == 0)
    def _init():
        acc_ref[...] = jnp.zeros_like(acc_ref)

    # fc1 partial over this hidden tile: (tm, C_in) @ (C_in, th) -> f32 (tm, th)
    h = jnp.dot(x_ref[...], w1_ref[...], preferred_element_type=jnp.float32)
    h = _gelu_f32(h + b1_ref[...].astype(jnp.float32), approximate)

    # fc2 partial: (tm, th) @ (th, C_out), accumulated in f32
    acc_ref[...] += jnp.dot(h.astype(w2_ref.dtype), w2_ref[...],
                            preferred_element_type=jnp.float32)

    @pl.when(k == pl.num_programs(1) - 1)
    def _finalize():
        o_ref[...] = (acc_ref[...] + b2_ref[...].astype(jnp.float32)).astype(o_ref.dtype)


# ---------------------------------------------------------------------------
# Tile / VMEM sizing
# ---------------------------------------------------------------------------
def _vmem_budget_bytes():
    cap = None
    try:
        cap = getattr(pltpu.get_tpu_info(), "vmem_capacity_bytes", None)
    except Exception:
        cap = None
    if cap is None:
        cap = 64 * 1024 * 1024                       # conservative (v7x-sized)
    if cap >= 96 * 1024 * 1024:                      # 128 MiB parts: v5e / v6e
        return 100 * 1024 * 1024
    # 64 MiB parts (v7x): leave headroom for Mosaic internal scratch/semaphores
    return max(cap - 8 * 1024 * 1024, 32 * 1024 * 1024)


def _select_tiles(N, C_in_p, H0, C_out_p, cb, ob, budget, tm_req, th_req):
    """Return (resident, tm, th, H_p, est_bytes)."""
    row_cap = _round_up(max(N, 1), 8)
    fudge = 1 << 20  # biases, semaphores, misc

    def resident_bytes(tm):
        return (2 * tm * C_in_p * cb              # x tiles (double-buffered)
                + 2 * tm * C_out_p * ob           # output tiles
                + 2 * (C_in_p * H0 + H0 * C_out_p) * cb   # resident weights
                + 4 * (H0 + C_out_p) * 4          # biases
                + fudge)

    def ktiled_bytes(tm, th):
        return (2 * tm * C_in_p * cb
                + 2 * C_in_p * th * cb
                + 2 * th * C_out_p * cb
                + 2 * tm * C_out_p * ob
                + tm * C_out_p * 4                # f32 accumulator scratch
                + 4 * (th + C_out_p) * 4
                + fudge)

    if tm_req is not None:
        tm_cands = [max(8, _round_up(min(int(tm_req), row_cap), 8))]
    else:
        tm_cands = sorted({min(c, row_cap)
                           for c in (2048, 1024, 512, 256, 128, 64, 32, 16, 8)},
                          reverse=True)

    # An explicit th smaller than the (padded) hidden dim forces the k-tiled path.
    force_ktiled = th_req is not None and _round_up(int(th_req), 128) < H0

    if not force_ktiled:
        for tm in tm_cands:
            if resident_bytes(tm) <= budget:
                return True, tm, H0, H0, resident_bytes(tm)

    if th_req is not None:
        th_cands = [min(_round_up(int(th_req), 128), H0)]
    else:
        th_cands = sorted({min(c, H0) for c in (2048, 1024, 512, 256, 128)},
                          reverse=True)

    for tm in tm_cands:
        for th in th_cands:
            if ktiled_bytes(tm, th) <= budget:
                return False, tm, th, _round_up(H0, th), ktiled_bytes(tm, th)

    tm, th = tm_cands[-1], th_cands[-1]
    return False, tm, th, _round_up(H0, th), ktiled_bytes(tm, th)


# ---------------------------------------------------------------------------
# Wrapper
# ---------------------------------------------------------------------------
def mlp_pallas(x, w1, b1, w2, b2, *, compute_dtype=None, approximate=False,
               tm=None, th=None, interpret=False):
    """x: [B, S, C_in]; w1: [C_in, H]; b1: [H]; w2: [H, C_out]; b2: [C_out].

    Computes Dropout0(fc2(GELU(fc1(x)))) == fc2(GELU(fc1(x))).
    compute_dtype=jnp.bfloat16 runs the matmuls at full MXU rate (f32 accum kept).
    """
    orig_dtype = x.dtype
    B, S, C_in = x.shape
    H = w1.shape[1]
    C_out = w2.shape[1]
    N = B * S

    cd = jnp.dtype(compute_dtype) if compute_dtype is not None else jnp.dtype(orig_dtype)
    cb = cd.itemsize
    ob = jnp.dtype(orig_dtype).itemsize

    # Feature dims -> multiples of 128 (lane-dense, MXU-native).
    C_in_p = _round_up(C_in, 128)
    H0 = _round_up(H, 128)
    C_out_p = _round_up(C_out, 128)

    budget = _vmem_budget_bytes()
    resident, tm_sel, th_sel, H_p, est = _select_tiles(
        N, C_in_p, H0, C_out_p, cb, ob, budget, tm, th)

    N_p = _round_up(max(N, 1), tm_sel)

    # --- pad & cast (zero padding contributes exactly 0 to the result) ------
    # TODO(synk): for repeated calls with fixed params, pre-pad/pre-cast the
    # weights once outside (or call mlp_pallas under jax.jit so the pads fuse).
    x2 = jnp.pad(x.reshape(N, C_in), ((0, N_p - N), (0, C_in_p - C_in))).astype(cd)
    w1p = jnp.pad(w1, ((0, C_in_p - C_in), (0, H_p - H))).astype(cd)
    w2p = jnp.pad(w2, ((0, H_p - H), (0, C_out_p - C_out))).astype(cd)
    b1p = jnp.pad(b1.astype(jnp.float32), (0, H_p - H)).reshape(1, H_p)
    b2p = jnp.pad(b2.astype(jnp.float32), (0, C_out_p - C_out)).reshape(1, C_out_p)

    vmem_limit = int(min(budget, max(est * 5 // 4, 32 * 1024 * 1024)))

    cost = pl.CostEstimate(
        flops=2 * N * (C_in * H + H * C_out),
        transcendentals=N * H,
        bytes_accessed=(N * C_in * cb + (C_in * H + H * C_out) * cb
                        + (H + C_out) * 4 + N * C_out * ob))

    kernel_kwargs = dict(approximate=approximate)

    if resident:
        grid = (N_p // tm_sel,)
        out2 = pl.pallas_call(
            functools.partial(_mlp_kernel_resident, **kernel_kwargs),
            out_shape=jax.ShapeDtypeStruct((N_p, C_out_p), orig_dtype),
            grid_spec=pltpu.PrefetchScalarGridSpec(
                num_scalar_prefetch=0,
                grid=grid,
                in_specs=[
                    pl.BlockSpec((tm_sel, C_in_p), lambda i: (i, 0)),
                    pl.BlockSpec((C_in_p, H_p), lambda i: (0, 0)),    # VMEM-resident
                    pl.BlockSpec((1, H_p), lambda i: (0, 0)),
                    pl.BlockSpec((H_p, C_out_p), lambda i: (0, 0)),   # VMEM-resident
                    pl.BlockSpec((1, C_out_p), lambda i: (0, 0)),
                ],
                out_specs=pl.BlockSpec((tm_sel, C_out_p), lambda i: (i, 0)),
            ),
            compiler_params=pltpu.CompilerParams(
                dimension_semantics=("parallel",),
                vmem_limit_bytes=vmem_limit,
            ),
            cost_estimate=cost,
            interpret=interpret,
        )(x2, w1p, b1p, w2p, b2p)
    else:
        grid = (N_p // tm_sel, H_p // th_sel)
        out2 = pl.pallas_call(
            functools.partial(_mlp_kernel_ktiled, **kernel_kwargs),
            out_shape=jax.ShapeDtypeStruct((N_p, C_out_p), orig_dtype),
            grid_spec=pltpu.PrefetchScalarGridSpec(
                num_scalar_prefetch=0,
                grid=grid,
                in_specs=[
                    pl.BlockSpec((tm_sel, C_in_p), lambda i, k: (i, 0)),
                    pl.BlockSpec((C_in_p, th_sel), lambda i, k: (0, k)),
                    pl.BlockSpec((1, th_sel), lambda i, k: (0, k)),
                    pl.BlockSpec((th_sel, C_out_p), lambda i, k: (k, 0)),
                    pl.BlockSpec((1, C_out_p), lambda i, k: (0, 0)),
                ],
                out_specs=pl.BlockSpec((tm_sel, C_out_p), lambda i, k: (i, 0)),
                scratch_shapes=[pltpu.VMEM((tm_sel, C_out_p), jnp.float32)],
            ),
            compiler_params=pltpu.CompilerParams(
                dimension_semantics=("parallel", "arbitrary"),
                vmem_limit_bytes=vmem_limit,
            ),
            cost_estimate=cost,
            interpret=interpret,
        )(x2, w1p, b1p, w2p, b2p)

    return out2[:N, :C_out].reshape(B, S, C_out)


def mlp_reference(x, w1, b1, w2, b2):
    hp = jax.lax.Precision.HIGHEST
    h = jnp.einsum("bsc,ch->bsh", x, w1, precision=hp) + b1
    h = 0.5 * h * (1.0 + jax.lax.erf(h / jnp.sqrt(2.0)))
    return jnp.einsum("bsh,ho->bso", h, w2, precision=hp) + b2


if __name__ == "__main__":
    key = jax.random.PRNGKey(0)
    kx, k1, kb1, k2, kb2 = jax.random.split(key, 5)

    # ---- Test 1: tiny f32 shapes (in=16, hidden=32, out=16) ---------------
    # Exercises the weight-resident single-k path + feature-dim padding.
    B, S = 2, 8
    in_f, hid_f, out_f = 16, 32, 16
    x = jax.random.normal(kx, (B, S, in_f), jnp.float32)
    # nn.Linear param shapes: fc1.weight [hidden,in], fc2.weight [out,hidden].
    w1_t = jax.random.normal(k1, (hid_f, in_f), jnp.float32) * 0.05
    b1 = jax.random.normal(kb1, (hid_f,), jnp.float32) * 0.05
    w2_t = jax.random.normal(k2, (out_f, hid_f), jnp.float32) * 0.05
    b2 = jax.random.normal(kb2, (out_f,), jnp.float32) * 0.05
    w1, w2 = w1_t.T, w2_t.T   # kernel computes x @ W + b (== torch's x @ W.T + b)

    out = jax.block_until_ready(jax.jit(mlp_pallas)(x, w1, b1, w2, b2))
    ref = mlp_reference(x, w1, b1, w2, b2)
    assert out.shape == (B, S, out_f)
    assert jnp.allclose(out, ref, atol=1e-5, rtol=1e-5), "resident f32 path mismatch"

    # ---- Test 2: ragged N + forced multi-k reduction path ------------------
    B2, S2 = 2, 13                      # N=26 -> padded to 32 rows
    in2, hid2, outf2 = 16, 256, 16      # th=128 -> 2 k steps
    x2 = jax.random.normal(kx, (B2, S2, in2), jnp.float32)
    w1b = jax.random.normal(k1, (in2, hid2), jnp.float32) * 0.05
    b1b = jax.random.normal(kb1, (hid2,), jnp.float32) * 0.05
    w2b = jax.random.normal(k2, (hid2, outf2), jnp.float32) * 0.05
    b2b = jax.random.normal(kb2, (outf2,), jnp.float32) * 0.05
    out_k = jax.block_until_ready(mlp_pallas(x2, w1b, b1b, w2b, b2b, th=128))
    ref_k = mlp_reference(x2, w1b, b1b, w2b, b2b)
    assert out_k.shape == (B2, S2, outf2)
    assert jnp.allclose(out_k, ref_k, atol=1e-4, rtol=1e-4), "k-tiled path mismatch"

    # ---- Test 3: bf16 compute path (f32 accumulation, looser tolerance) ---
    out_bf = jax.block_until_ready(
        mlp_pallas(x, w1, b1, w2, b2, compute_dtype=jnp.bfloat16))
    assert jnp.allclose(out_bf, ref, atol=5e-2, rtol=5e-2), "bf16 path mismatch"

    print("KERNEL_OK")
</pallas_src>

<mosaic_0001>
module attributes {stable_mosaic.version = 11 : i64} {
  func.func @_mlp_kernel_resident(%arg0: i32, %arg1: memref<16x128xf32, #tpu.memory_space<vmem>>, %arg2: memref<128x128xf32, #tpu.memory_space<vmem>>, %arg3: memref<1x128xf32, #tpu.memory_space<vmem>>, %arg4: memref<128x128xf32, #tpu.memory_space<vmem>>, %arg5: memref<1x128xf32, #tpu.memory_space<vmem>>, %arg6: memref<16x128xf32, #tpu.memory_space<vmem>>) attributes {dimension_semantics = [#tpu.dimension_semantics<parallel>], iteration_bounds = array<i64: 1>, scalar_prefetch = 0 : i64, scratch_operands = 0 : i64, tpu.core_type = #tpu.core_type<tc>, window_params = [{transform_indices = @transform_0, window_bounds = array<i64: 16, 128>}, {pipeline_mode = #tpu.pipeline_mode<synchronous>, transform_indices = @transform_1, window_bounds = array<i64: 128, 128>}, {pipeline_mode = #tpu.pipeline_mode<synchronous>, transform_indices = @transform_2, window_bounds = array<i64: 1, 128>}, {pipeline_mode = #tpu.pipeline_mode<synchronous>, transform_indices = @transform_3, window_bounds = array<i64: 128, 128>}, {pipeline_mode = #tpu.pipeline_mode<synchronous>, transform_indices = @transform_4, window_bounds = array<i64: 1, 128>}, {transform_indices = @transform_5, window_bounds = array<i64: 16, 128>}]} {
    %c0 = arith.constant 0 : index
    %c0_0 = arith.constant 0 : index
    %0 = vector.load %arg1[%c0, %c0_0] : memref<16x128xf32, #tpu.memory_space<vmem>>, vector<16x128xf32>
    %c0_1 = arith.constant 0 : index
    %c0_2 = arith.constant 0 : index
    %1 = vector.load %arg2[%c0_1, %c0_2] : memref<128x128xf32, #tpu.memory_space<vmem>>, vector<128x128xf32>
    %cst = arith.constant dense<0.000000e+00> : vector<16x128xf32>
    %2 = tpu.matmul %0, %1, %cst {dimension_numbers = #tpu.dot_dimension_numbers<[1], [0], [0], [1], [0, 0, 1, 1], [], []>} : vector<16x128xf32>, vector<128x128xf32>, vector<16x128xf32> -> vector<16x128xf32>
    %c0_3 = arith.constant 0 : index
    %c0_4 = arith.constant 0 : index
    %3 = vector.load %arg3[%c0_3, %c0_4] : memref<1x128xf32, #tpu.memory_space<vmem>>, vector<1x128xf32>
    %4 = vector.broadcast %3 : vector<1x128xf32> to vector<16x128xf32>
    %5 = arith.addf %2, %4 : vector<16x128xf32>
    %cst_5 = arith.constant 5.000000e-01 : f32
    %6 = vector.broadcast %cst_5 : f32 to vector<16x128xf32>
    %7 = arith.mulf %6, %5 : vector<16x128xf32>
    %cst_6 = arith.constant 0.707106769 : f32
    %8 = vector.broadcast %cst_6 : f32 to vector<16x128xf32>
    %9 = arith.mulf %5, %8 : vector<16x128xf32>
    %10 = math.erf %9 : vector<16x128xf32>
    %cst_7 = arith.constant 1.000000e+00 : f32
    %11 = vector.broadcast %cst_7 : f32 to vector<16x128xf32>
    %12 = arith.addf %11, %10 : vector<16x128xf32>
    %13 = arith.mulf %7, %12 : vector<16x128xf32>
    %c0_8 = arith.constant 0 : index
    %c0_9 = arith.constant 0 : index
    %14 = vector.load %arg4[%c0_8, %c0_9] : memref<128x128xf32, #tpu.memory_space<vmem>>, vector<128x128xf32>
    %cst_10 = arith.constant dense<0.000000e+00> : vector<16x128xf32>
    %15 = tpu.matmul %13, %14, %cst_10 {dimension_numbers = #tpu.dot_dimension_numbers<[1], [0], [0], [1], [0, 0, 1, 1], [], []>} : vector<16x128xf32>, vector<128x128xf32>, vector<16x128xf32> -> vector<16x128xf32>
    %c0_11 = arith.constant 0 : index
    %c0_12 = arith.constant 0 : index
    %16 = vector.load %arg5[%c0_11, %c0_12] : memref<1x128xf32, #tpu.memory_space<vmem>>, vector<1x128xf32>
    %17 = vector.broadcast %16 : vector<1x128xf32> to vector<16x128xf32>
    %18 = arith.addf %15, %17 : vector<16x128xf32>
    %c0_13 = arith.constant 0 : index
    %c0_14 = arith.constant 0 : index
    %19 = vector.load %arg6[%c0_13, %c0_14] : memref<16x128xf32, #tpu.memory_space<vmem>>, vector<16x128xf32>
    tpu.vector_store %arg6[%c0_13, %c0_14], %18 {strides = array<i32>} : memref<16x128xf32, #tpu.memory_space<vmem>>, vector<16x128xf32>,
    return
  }
  func.func @transform_0(%arg0: i32) -> (i32, i32) {
    %c0_i32 = arith.constant 0 : i32
    %c0_i32_0 = arith.constant 0 : i32
    return %arg0, %c0_i32 : i32, i32
  }
  func.func @transform_1(%arg0: i32) -> (i32, i32) {
    %c0_i32 = arith.constant 0 : i32
    %c0_i32_0 = arith.constant 0 : i32
    %c0_i32_1 = arith.constant 0 : i32
    return %c0_i32, %c0_i32_0 : i32, i32
  }
  func.func @transform_2(%arg0: i32) -> (i32, i32) {
    %c0_i32 = arith.constant 0 : i32
    %c0_i32_0 = arith.constant 0 : i32
    %c0_i32_1 = arith.constant 0 : i32
    return %c0_i32, %c0_i32_0 : i32, i32
  }
  func.func @transform_3(%arg0: i32) -> (i32, i32) {
    %c0_i32 = arith.constant 0 : i32
    %c0_i32_0 = arith.constant 0 : i32
    %c0_i32_1 = arith.constant 0 : i32
    return %c0_i32, %c0_i32_0 : i32, i32
  }
  func.func @transform_4(%arg0: i32) -> (i32, i32) {
    %c0_i32 = arith.constant 0 : i32
    %c0_i32_0 = arith.constant 0 : i32
    %c0_i32_1 = arith.constant 0 : i32
    return %c0_i32, %c0_i32_0 : i32, i32
  }
  func.func @transform_5(%arg0: i32) -> (i32, i32) {
    %c0_i32 = arith.constant 0 : i32
    %c0_i32_0 = arith.constant 0 : i32
    return %arg0, %c0_i32 : i32, i32
  }
}

</mosaic_0001>

<bundles_post_ra>
// kernel: mlp_pallas.1
= control target key start
LH: loop header
LB: loop body
LE: loop exit
PB: predicated region body
PF: predicated region fallthrough
CT: control target
= control target key end

     0   :  { %s490_s1 = inlined_call_operand.vmem [shape: f32[128,128], index: 1, kind: input, shape index: {}]   ;;  %s491_s0 = inlined_call_operand.vmem [shape: f32[16,128], index: 0, kind: input, shape index: {}]   ;;  %s492_s3 = inlined_call_operand.vmem [shape: f32[128,128], index: 3, kind: input, shape index: {}]   ;;  %s493_s2 = inlined_call_operand.vmem [shape: f32[1,128], index: 2, kind: input, shape index: {}]   ;;  %s494_s4 = inlined_call_operand.vmem [shape: f32[1,128], index: 4, kind: input, shape index: {}]   ;;  %s495_s5 = inlined_call_operand.vmem [shape: f32[16,128], index: 5, kind: output, shape index: {}]  }
   0x1   :  { %v37_v0 = vld [vmem:[%s490_s1 + $0x78] sm:$0xff]  ;;  %v36_v1 = vld [vmem:[%s490_s1 + $0x70] sm:$0xff]  ;;  %v35_v2 = vld [vmem:[%s490_s1 + $0x68] sm:$0xff] }
   0x2   :  { %272 = vmatprep.subr.mxu0 %v37_v0  ;;  %v34_v3 = vld [vmem:[%s490_s1 + $0x60] sm:$0xff]  ;;  %v33_v5 = vld [vmem:[%s490_s1 + $0x58] sm:$0xff]  ;;  %v144_v7 = vld [vmem:[%s492_s3 + $0x70] sm:$0xff] }
   0x3   :  { %273 = vmatpush3.msra.mxu0 %v37_v0  ;;  %v20_v4 = vld [vmem:[%s491_s0] sm:$0xff]  ;;  %v145_v6 = vld [vmem:[%s492_s3 + $0x78] sm:$0xff]  ;;  %v32_v8 = vld [vmem:[%s490_s1 + $0x50] sm:$0xff] }
   0x4   :  { %274 = vmatprep.subr.mxu0 %v36_v1  ;;  %304 = vmatprep.mubr.f32.mxu0 %v20_v4  ;;  %v143_v9 = vld [vmem:[%s492_s3 + $0x68] sm:$0xff]  ;;  %v30_v11 = vld [vmem:[%s490_s1 + $0x40] sm:$0xff]  ;;  %v29_v12 = vld [vmem:[%s490_s1 + $0x38] sm:$0xff] }
   0x5   :  { %275 = vmatpush3.msra.mxu0 %v36_v1  ;;  %307 = vmatprep.subr.mxu1 %v145_v6  ;;  %v31_v10 = vld [vmem:[%s490_s1 + $0x48] sm:$0xff]  ;;  %v28_v13 = vld [vmem:[%s490_s1 + $0x30] sm:$0xff]  ;;  %v26_v15 = vld [vmem:[%s490_s1 + $0x20] sm:$0xff] }
   0x6   :  { %276 = vmatprep.subr.mxu0 %v35_v2  ;;  %308 = vmatpush3.msra.mxu1 %v145_v6  ;;  %v27_v14 = vld [vmem:[%s490_s1 + $0x28] sm:$0xff]  ;;  %v25_v16 = vld [vmem:[%s490_s1 + $0x18] sm:$0xff]  ;;  %v24_v17 = vld [vmem:[%s490_s1 + $0x10] sm:$0xff] }
   0x7   :  { %277 = vmatpush3.msra.mxu0 %v35_v2  ;;  %309 = vmatprep.subr.mxu1 %v144_v7  ;;  %v23_v18 = vld [vmem:[%s490_s1 + $0x8] sm:$0xff]  ;;  %v22_v19 = vld [vmem:[%s490_s1] sm:$0xff]  ;;  %v141_v22 = vld [vmem:[%s492_s3 + $0x58] sm:$0xff] }
   0x8   :  { %278 = vmatprep.subr.mxu0 %v34_v3  ;;  %310 = vmatpush3.msra.mxu1 %v144_v7  ;;  %v21_v20 = vld [vmem:[%s491_s0 + $0x8] sm:$0xff]  ;;  %v142_v21 = vld [vmem:[%s492_s3 + $0x60] sm:$0xff]  ;;  %v140_v23 = vld [vmem:[%s492_s3 + $0x50] sm:$0xff] }
   0x9   :  { %279 = vmatpush3.msra.mxu0 %v34_v3  ;;  %311 = vmatprep.subr.mxu1 %v143_v9  ;;  %v139_v24 = vld [vmem:[%s492_s3 + $0x48] sm:$0xff]  ;;  %v138_v25 = vld [vmem:[%s492_s3 + $0x40] sm:$0xff]  ;;  %v137_v26 = vld [vmem:[%s492_s3 + $0x38] sm:$0xff] }
   0xa   :  { %280 = vmatprep.subr.mxu0 %v33_v5  ;;  %312 = vmatpush3.msra.mxu1 %v143_v9  ;;  %v136_v27 = vld [vmem:[%s492_s3 + $0x30] sm:$0xff]  ;;  %v135_v28 = vld [vmem:[%s492_s3 + $0x28] sm:$0xff]  ;;  %v134_v29 = vld [vmem:[%s492_s3 + $0x20] sm:$0xff] }
   0xb   :  { %281 = vmatpush3.msra.mxu0 %v33_v5  ;;  %313 = vmatprep.subr.mxu1 %v142_v21  ;;  %v133_v30 = vld [vmem:[%s492_s3 + $0x18] sm:$0xff]  ;;  %v132_v31 = vld [vmem:[%s492_s3 + $0x10] sm:$0xff]  ;;  %v131_v32 = vld [vmem:[%s492_s3 + $0x8] sm:$0xff] }
   0xc   :  { %282 = vmatprep.subr.mxu0 %v32_v8  ;;  %314 = vmatpush3.msra.mxu1 %v142_v21  ;;  %v130_v33 = vld [vmem:[%s492_s3] sm:$0xff] }
   0xd   :  { %283 = vmatpush3.msra.mxu0 %v32_v8  ;;  %315 = vmatprep.subr.mxu1 %v141_v22  ;;  %v234_v34 = vld [vmem:[%s493_s2] ss:$0 sm:$0xff] }
   0xe   :  { %284 = vmatprep.subr.mxu0 %v31_v10  ;;  %316 = vmatpush3.msra.mxu1 %v141_v22  ;;  %v235_v49 = vld [vmem:[%s494_s4] ss:$0 sm:$0xff] }
   0xf   :  { %285 = vmatpush3.msra.mxu0 %v31_v10  ;;  %317 = vmatprep.subr.mxu1 %v140_v23 }
  0x10   :  { %286 = vmatprep.subr.mxu0 %v30_v11  ;;  %318 = vmatpush3.msra.mxu1 %v140_v23 }
  0x11   :  { %287 = vmatpush3.msra.mxu0 %v30_v11  ;;  %319 = vmatprep.subr.mxu1 %v139_v24 }
  0x12   :  { %288 = vmatprep.subr.mxu0 %v29_v12  ;;  %320 = vmatpush3.msra.mxu1 %v139_v24 }
  0x13   :  { %289 = vmatpush3.msra.mxu0 %v29_v12  ;;  %321 = vmatprep.subr.mxu1 %v138_v25 }
  0x14   :  { %290 = vmatprep.subr.mxu0 %v28_v13  ;;  %322 = vmatpush3.msra.mxu1 %v138_v25 }
  0x15   :  { %291 = vmatpush3.msra.mxu0 %v28_v13  ;;  %323 = vmatprep.subr.mxu1 %v137_v26 }
  0x16   :  { %292 = vmatprep.subr.mxu0 %v27_v14  ;;  %324 = vmatpush3.msra.mxu1 %v137_v26 }
  0x17   :  { %293 = vmatpush3.msra.mxu0 %v27_v14  ;;  %325 = vmatprep.subr.mxu1 %v136_v27 }
  0x18   :  { %294 = vmatprep.subr.mxu0 %v26_v15  ;;  %326 = vmatpush3.msra.mxu1 %v136_v27 }
  0x19   :  { %295 = vmatpush3.msra.mxu0 %v26_v15  ;;  %327 = vmatprep.subr.mxu1 %v135_v28 }
  0x1a   :  { %296 = vmatprep.subr.mxu0 %v25_v16  ;;  %328 = vmatpush3.msra.mxu1 %v135_v28 }
  0x1b   :  { %297 = vmatpush3.msra.mxu0 %v25_v16  ;;  %329 = vmatprep.subr.mxu1 %v134_v29 }
  0x1c   :  { %298 = vmatprep.subr.mxu0 %v24_v17  ;;  %330 = vmatpush3.msra.mxu1 %v134_v29 }
  0x1d   :  { %299 = vmatpush3.msra.mxu0 %v24_v17  ;;  %331 = vmatprep.subr.mxu1 %v133_v30 }
  0x1e   :  { %300 = vmatprep.subr.mxu0 %v23_v18  ;;  %332 = vmatpush3.msra.mxu1 %v133_v30 }
  0x1f   :  { %301 = vmatpush3.msra.mxu0 %v23_v18  ;;  %333 = vmatprep.subr.mxu1 %v132_v31 }
  0x20   :  { %302 = vmatprep.subr.mxu0 %v22_v19  ;;  %334 = vmatpush3.msra.mxu1 %v132_v31 }
  0x21   :  { %303 = vmatpush3.msra.mxu0 %v22_v19  ;;  %335 = vmatprep.subr.mxu1 %v131_v32 }
  0x22   :  { %305 = vmatmul.mubr.f32.vlgmr.msra.gmra.mxu0 %v21_v20  ;;  %336 = vmatpush3.msra.mxu1 %v131_v32 }
  0x23   :  { %337 = vmatprep.subr.mxu1 %v130_v33 }
  0x24   :  { %338 = vmatpush3.msra.mxu1 %v130_v33 }
  0xe2   :  { %v306_v35 = vpop.f32.mrf.mxu0 }
  0xe3   :  { %v117_v36 = vadd.f32 %v306_v35, %v234_v34 }
  0xe4   :  { %v111_v37 = vpop.f32.mrf.mxu0 }
  0xe5   :  { %v123_v38 = vmul.f32 0.70710677, %v117_v36  ;;  %v112_v39 = vadd.f32 %v234_v34, %v111_v37  ;;  %v121_v46 = vmul.f32 0.5, %v117_v36 }
  0xe7   :  { %342 = verf.f32 %v123_v38  ;;  %v122_v40 = vmul.f32 0.70710677, %v112_v39  ;;  %v120_v44 = vmul.f32 0.5, %v112_v39 }
  0xe9   :  { %344 = verf.f32 %v122_v40 }
  0xf4   :  { %v343_v41 = vpop.eup %342 }
  0xf5   :  { %v127_v43 = vadd.f32 1.0, %v343_v41 }
  0xf6   :  { %v345_v42 = vpop.eup %344 }
  0xf7   :  { %v126_v45 = vadd.f32 1.0, %v345_v42  ;;  %v129_v48 = vmul.f32 %v127_v43, %v121_v46 }
  0xf9   :  { %v128_v47 = vmul.f32 %v126_v45, %v120_v44 }
  0xfb   :  { %339 = vmatprep.mubr.f32.mxu1 %v128_v47 }
  0xfc   :  { %340 = vmatmul.mubr.f32.vlgmr.msra.gmra.mxu1 %v129_v48 }
 0x1bc   :  { %v341_v50 = vpop.f32.mrf.mxu1 }
 0x1bd   :  { %v225_v51 = vadd.f32 %v341_v50, %v235_v49 }
 0x1be   :  { %v219_v52 = vpop.f32.mrf.mxu1 }
 0x1bf   :  { %229 = vst [vmem:[%s495_s5 + $0x8] sm:$0xff] %v225_v51  ;;  %v220_v53 = vadd.f32 %v235_v49, %v219_v52 }
 0x1c1   :  { %228 = vst [vmem:[%s495_s5] sm:$0xff] %v220_v53 }

</bundles_post_ra>
